<compile_context>
chip_gen: v6e
topology: v6e:2x2x1
jax: 0.10.0
libtpu: 0.0.40
codegen_flags: <defaults>
</compile_context>

<pallas_src>
import functools

import jax
import jax.numpy as jnp
from jax.experimental import pallas as pl
from jax.experimental.pallas import tpu as pltpu

HEAD_N = 128  # lane-dense width of the fused head / output slab
NEG_BIG = -1e30


def _round_up(x, m):
    return ((x + m - 1) // m) * m


def shared_ac_kernel(
    x_ref,
    wf_ref, bf_ref,          # feature extractor:  (S, H), (1, H)
    wh_ref, bh_ref,          # fused hidden:       (H, 2H), (1, 2H)   [actor | critic]
    whead_ref, bhead_ref,    # fused head:         (2H, HEAD_N), (1, HEAD_N)
    out_ref,                 # (TB, HEAD_N): lanes [0:A]=probs, lane A=value
    *, action_size,
):
    x = x_ref[...]

    # --- feature extractor: Linear(state, hidden) + tanh ---
    feats = jnp.tanh(
        jnp.dot(x, wf_ref[...], preferred_element_type=jnp.float32) + bf_ref[...]
    )

    # --- fused actor+critic hidden layer: one (H -> 2H) matmul + tanh ---
    h = jnp.tanh(
        jnp.dot(feats, wh_ref[...], preferred_element_type=jnp.float32) + bh_ref[...]
    )

    # --- fused heads: block-diagonal (2H -> HEAD_N) matmul ---
    # lanes [0:A] = actor logits (h_a @ Wa2 + ba2), lane A = critic value.
    head = (
        jnp.dot(h, whead_ref[...], preferred_element_type=jnp.float32) + bhead_ref[...]
    )

    lane = jax.lax.broadcasted_iota(jnp.int32, head.shape, 1)

    # softmax over the real logit lanes only (padded lanes masked to -inf-ish)
    logits = jnp.where(lane < action_size, head, NEG_BIG)
    m = jnp.max(logits, axis=1, keepdims=True)
    e = jnp.exp(logits - m)
    denom = jnp.sum(e, axis=1, keepdims=True)
    r = pl.reciprocal(denom, approx=True)
    r = r * (2.0 - denom * r)  # one Newton step -> ~1e-7 relative error
    probs = e * r              # padded lanes are exactly/near 0

    # lane-dense output slab: probs in [0:A], value in lane A, zeros elsewhere
    out_ref[...] = jnp.where(lane == action_size, head, probs).astype(out_ref.dtype)


def shared_actor_critic_forward(x, params):
    """x: [B, state_size] float32. Returns dict(probs=[B, A], value=[B])."""
    B, S = x.shape
    H = params["wa1"].shape[0]          # n_hidden (128)
    A = params["wa2"].shape[1]          # action_size
    assert A + 1 <= HEAD_N, "action_size must fit in the 128-lane head slab"

    # ---- build fused weights in the wrapper (cheap, could be cached) ----
    w_h = jnp.concatenate([params["wa1"], params["wc1"]], axis=1)        # (H, 2H)
    b_h = jnp.concatenate([params["ba1"], params["bc1"]], axis=1)        # (1, 2H)

    w_head = jnp.zeros((2 * H, HEAD_N), jnp.float32)
    w_head = w_head.at[:H, :A].set(params["wa2"])                        # actor head
    w_head = w_head.at[H:, A].set(params["wc2"][:, 0])                   # critic head
    b_head = jnp.zeros((1, HEAD_N), jnp.float32)
    b_head = b_head.at[:, :A].set(params["ba2"])
    b_head = b_head.at[:, A].set(params["bc2"][:, 0])

    # ---- batch tiling (sublane-aligned); weights stay VMEM-resident ----
    TB = min(512, _round_up(B, 8))
    Bp = _round_up(B, TB)
    x_p = jnp.pad(x, ((0, Bp - B), (0, 0))) if Bp != B else x
    grid = (Bp // TB,)

    def wspec(arr):
        return pl.BlockSpec(arr.shape, lambda i: (0, 0))

    in_specs = [
        pl.BlockSpec((TB, S), lambda i: (i, 0)),     # x: tiled along batch
        wspec(params["wf"]), wspec(params["bf"]),
        wspec(w_h), wspec(b_h),
        wspec(w_head), wspec(b_head),
    ]
    out_specs = pl.BlockSpec((TB, HEAD_N), lambda i: (i, 0))
    out_shape = jax.ShapeDtypeStruct((Bp, HEAD_N), jnp.float32)

    out = pl.pallas_call(
        functools.partial(shared_ac_kernel, action_size=A),
        out_shape=out_shape,
        grid=grid,
        in_specs=in_specs,
        out_specs=out_specs,
        compiler_params=pltpu.CompilerParams(
            dimension_semantics=("parallel",),
        ),
    )(x_p, params["wf"], params["bf"], w_h, b_h, w_head, b_head)

    out = out[:B]
    return dict(probs=out[:, :A], value=out[:, A])


def init_params(key, state_size, n_hidden, action_size):
    """Deterministic synthetic init (stand-in for InitLinear's scheme)."""
    ks = jax.random.split(key, 10)

    def lin(kw, fan_in, fan_out, gain):
        w = gain * jax.random.normal(kw, (fan_in, fan_out), jnp.float32) / jnp.sqrt(fan_in)
        b = jnp.zeros((1, fan_out), jnp.float32)
        return w, b

    tanh_gain = 5.0 / 3.0
    wf, bf = lin(ks[0], state_size, n_hidden, tanh_gain)     # feature extractor
    wa1, ba1 = lin(ks[1], n_hidden, n_hidden, tanh_gain)     # actor hidden
    wa2, ba2 = lin(ks[2], n_hidden, action_size, 1.0)        # actor probs head
    wc1, bc1 = lin(ks[3], n_hidden, n_hidden, tanh_gain)     # critic hidden
    wc2, bc2 = lin(ks[4], n_hidden, 1, 1.0)                  # critic value head
    return dict(
        wf=wf, bf=bf,
        wa1=wa1, ba1=ba1,
        wa2=wa2, ba2=ba2,
        wc1=wc1, bc1=bc1,
        wc2=wc2, bc2=bc2,
    )


def reference_forward(x, p):
    feats = jnp.tanh(x @ p["wf"] + p["bf"])
    h_a = jnp.tanh(feats @ p["wa1"] + p["ba1"])
    probs = jax.nn.softmax(h_a @ p["wa2"] + p["ba2"], axis=1)
    h_c = jnp.tanh(feats @ p["wc1"] + p["bc1"])
    value = (h_c @ p["wc2"] + p["bc2"])[:, 0]
    return dict(probs=probs, value=value)


if __name__ == "__main__":
    key = jax.random.PRNGKey(0)
    kx, kp = jax.random.split(key)

    batch = 8
    state_size = 16
    action_size = 6
    n_hidden = 128  # fixed by SharedActorCritic.__init__

    x = jax.random.normal(kx, (batch, state_size), jnp.float32)
    params = init_params(kp, state_size, n_hidden, action_size)

    out = shared_actor_critic_forward(x, params)
    jax.block_until_ready(out)

    ref = reference_forward(x, params)
    assert out["probs"].shape == (batch, action_size)
    assert out["value"].shape == (batch,)
    assert jnp.allclose(out["probs"], ref["probs"], atol=1e-5, rtol=1e-5)
    assert jnp.allclose(out["value"], ref["value"], atol=1e-5, rtol=1e-5)

    print("KERNEL_OK")
</pallas_src>

<mosaic_0001>
module attributes {stable_mosaic.version = 11 : i64} {
  func.func @shared_ac_kernel(%arg0: i32, %arg1: memref<8x16xf32, #tpu.memory_space<vmem>>, %arg2: memref<16x128xf32, #tpu.memory_space<vmem>>, %arg3: memref<1x128xf32, #tpu.memory_space<vmem>>, %arg4: memref<128x256xf32, #tpu.memory_space<vmem>>, %arg5: memref<1x256xf32, #tpu.memory_space<vmem>>, %arg6: memref<256x128xf32, #tpu.memory_space<vmem>>, %arg7: memref<1x128xf32, #tpu.memory_space<vmem>>, %arg8: memref<8x128xf32, #tpu.memory_space<vmem>>) attributes {dimension_semantics = [#tpu.dimension_semantics<parallel>], iteration_bounds = array<i64: 1>, scalar_prefetch = 0 : i64, scratch_operands = 0 : i64, tpu.core_type = #tpu.core_type<tc>, window_params = [{transform_indices = @transform_0, window_bounds = array<i64: 8, 16>}, {pipeline_mode = #tpu.pipeline_mode<synchronous>, transform_indices = @transform_1, window_bounds = array<i64: 16, 128>}, {pipeline_mode = #tpu.pipeline_mode<synchronous>, transform_indices = @transform_2, window_bounds = array<i64: 1, 128>}, {pipeline_mode = #tpu.pipeline_mode<synchronous>, transform_indices = @transform_3, window_bounds = array<i64: 128, 256>}, {pipeline_mode = #tpu.pipeline_mode<synchronous>, transform_indices = @transform_4, window_bounds = array<i64: 1, 256>}, {pipeline_mode = #tpu.pipeline_mode<synchronous>, transform_indices = @transform_5, window_bounds = array<i64: 256, 128>}, {pipeline_mode = #tpu.pipeline_mode<synchronous>, transform_indices = @transform_6, window_bounds = array<i64: 1, 128>}, {transform_indices = @transform_7, window_bounds = array<i64: 8, 128>}]} {
    %c0 = arith.constant 0 : index
    %c0_0 = arith.constant 0 : index
    %0 = vector.load %arg1[%c0, %c0_0] : memref<8x16xf32, #tpu.memory_space<vmem>>, vector<8x16xf32>
    %c0_1 = arith.constant 0 : index
    %c0_2 = arith.constant 0 : index
    %1 = vector.load %arg2[%c0_1, %c0_2] : memref<16x128xf32, #tpu.memory_space<vmem>>, vector<16x128xf32>
    %cst = arith.constant dense<0.000000e+00> : vector<8x128xf32>
    %2 = tpu.matmul %0, %1, %cst {dimension_numbers = #tpu.dot_dimension_numbers<[1], [0], [0], [1], [0, 0, 1, 1], [], []>} : vector<8x16xf32>, vector<16x128xf32>, vector<8x128xf32> -> vector<8x128xf32>
    %c0_3 = arith.constant 0 : index
    %c0_4 = arith.constant 0 : index
    %3 = vector.load %arg3[%c0_3, %c0_4] : memref<1x128xf32, #tpu.memory_space<vmem>>, vector<1x128xf32>
    %4 = vector.broadcast %3 : vector<1x128xf32> to vector<8x128xf32>
    %5 = arith.addf %2, %4 : vector<8x128xf32>
    %6 = math.tanh %5 : vector<8x128xf32>
    %c0_5 = arith.constant 0 : index
    %c0_6 = arith.constant 0 : index
    %7 = vector.load %arg4[%c0_5, %c0_6] : memref<128x256xf32, #tpu.memory_space<vmem>>, vector<128x256xf32>
    %cst_7 = arith.constant dense<0.000000e+00> : vector<8x256xf32>
    %8 = tpu.matmul %6, %7, %cst_7 {dimension_numbers = #tpu.dot_dimension_numbers<[1], [0], [0], [1], [0, 0, 1, 1], [], []>} : vector<8x128xf32>, vector<128x256xf32>, vector<8x256xf32> -> vector<8x256xf32>
    %c0_8 = arith.constant 0 : index
    %c0_9 = arith.constant 0 : index
    %9 = vector.load %arg5[%c0_8, %c0_9] : memref<1x256xf32, #tpu.memory_space<vmem>>, vector<1x256xf32>
    %10 = vector.broadcast %9 : vector<1x256xf32> to vector<8x256xf32>
    %11 = arith.addf %8, %10 : vector<8x256xf32>
    %12 = math.tanh %11 : vector<8x256xf32>
    %c0_10 = arith.constant 0 : index
    %c0_11 = arith.constant 0 : index
    %13 = vector.load %arg6[%c0_10, %c0_11] : memref<256x128xf32, #tpu.memory_space<vmem>>, vector<256x128xf32>
    %cst_12 = arith.constant dense<0.000000e+00> : vector<8x128xf32>
    %14 = tpu.matmul %12, %13, %cst_12 {dimension_numbers = #tpu.dot_dimension_numbers<[1], [0], [0], [1], [0, 0, 1, 1], [], []>} : vector<8x256xf32>, vector<256x128xf32>, vector<8x128xf32> -> vector<8x128xf32>
    %c0_13 = arith.constant 0 : index
    %c0_14 = arith.constant 0 : index
    %15 = vector.load %arg7[%c0_13, %c0_14] : memref<1x128xf32, #tpu.memory_space<vmem>>, vector<1x128xf32>
    %16 = vector.broadcast %15 : vector<1x128xf32> to vector<8x128xf32>
    %17 = arith.addf %14, %16 : vector<8x128xf32>
    %18 = tpu.iota {dimensions = array<i32: 1>} : vector<8x128xi32>
    %c6_i32 = arith.constant 6 : i32
    %19 = vector.broadcast %c6_i32 : i32 to vector<8x128xi32>
    %20 = arith.cmpi slt, %18, %19 : vector<8x128xi32>
    %cst_15 = arith.constant -1.000000e+30 : f32
    %21 = vector.broadcast %cst_15 : f32 to vector<8x128xf32>
    %22 = arith.select %20, %17, %21 : vector<8x128xi1>, vector<8x128xf32>
    %cst_16 = arith.constant dense<0xFF800000> : vector<8xf32>
    %23 = vector.multi_reduction <maximumf>, %22, %cst_16 [1] : vector<8x128xf32> to vector<8xf32>
    %24 = vector.shape_cast %23 : vector<8xf32> to vector<8x1xf32>
    %25 = vector.broadcast %24 : vector<8x1xf32> to vector<8x128xf32>
    %26 = arith.subf %22, %25 : vector<8x128xf32>
    %27 = math.exp %26 : vector<8x128xf32>
    %cst_17 = arith.constant dense<0.000000e+00> : vector<8xf32>
    %28 = vector.multi_reduction <add>, %27, %cst_17 [1] : vector<8x128xf32> to vector<8xf32>
    %29 = vector.shape_cast %28 : vector<8xf32> to vector<8x1xf32>
    %30 = tpu.reciprocal %29 {approx = true} : vector<8x1xf32> -> vector<8x1xf32>
    %31 = arith.mulf %29, %30 : vector<8x1xf32>
    %cst_18 = arith.constant 2.000000e+00 : f32
    %32 = vector.broadcast %cst_18 : f32 to vector<8x1xf32>
    %33 = arith.subf %32, %31 : vector<8x1xf32>
    %34 = arith.mulf %30, %33 : vector<8x1xf32>
    %35 = vector.broadcast %34 : vector<8x1xf32> to vector<8x128xf32>
    %36 = arith.mulf %27, %35 : vector<8x128xf32>
    %c6_i32_19 = arith.constant 6 : i32
    %37 = vector.broadcast %c6_i32_19 : i32 to vector<8x128xi32>
    %38 = arith.cmpi eq, %18, %37 : vector<8x128xi32>
    %39 = arith.select %38, %17, %36 : vector<8x128xi1>, vector<8x128xf32>
    %c0_20 = arith.constant 0 : index
    %c0_21 = arith.constant 0 : index
    %40 = vector.load %arg8[%c0_20, %c0_21] : memref<8x128xf32, #tpu.memory_space<vmem>>, vector<8x128xf32>
    tpu.vector_store %arg8[%c0_20, %c0_21], %39 {strides = array<i32>} : memref<8x128xf32, #tpu.memory_space<vmem>>, vector<8x128xf32>,
    return
  }
  func.func @transform_0(%arg0: i32) -> (i32, i32) {
    %c0_i32 = arith.constant 0 : i32
    %c0_i32_0 = arith.constant 0 : i32
    return %arg0, %c0_i32 : i32, i32
  }
  func.func @transform_1(%arg0: i32) -> (i32, i32) {
    %c0_i32 = arith.constant 0 : i32
    %c0_i32_0 = arith.constant 0 : i32
    %c0_i32_1 = arith.constant 0 : i32
    return %c0_i32, %c0_i32_0 : i32, i32
  }
  func.func @transform_2(%arg0: i32) -> (i32, i32) {
    %c0_i32 = arith.constant 0 : i32
    %c0_i32_0 = arith.constant 0 : i32
    %c0_i32_1 = arith.constant 0 : i32
    return %c0_i32, %c0_i32_0 : i32, i32
  }
  func.func @transform_3(%arg0: i32) -> (i32, i32) {
    %c0_i32 = arith.constant 0 : i32
    %c0_i32_0 = arith.constant 0 : i32
    %c0_i32_1 = arith.constant 0 : i32
    return %c0_i32, %c0_i32_0 : i32, i32
  }
  func.func @transform_4(%arg0: i32) -> (i32, i32) {
    %c0_i32 = arith.constant 0 : i32
    %c0_i32_0 = arith.constant 0 : i32
    %c0_i32_1 = arith.constant 0 : i32
    return %c0_i32, %c0_i32_0 : i32, i32
  }
  func.func @transform_5(%arg0: i32) -> (i32, i32) {
    %c0_i32 = arith.constant 0 : i32
    %c0_i32_0 = arith.constant 0 : i32
    %c0_i32_1 = arith.constant 0 : i32
    return %c0_i32, %c0_i32_0 : i32, i32
  }
  func.func @transform_6(%arg0: i32) -> (i32, i32) {
    %c0_i32 = arith.constant 0 : i32
    %c0_i32_0 = arith.constant 0 : i32
    %c0_i32_1 = arith.constant 0 : i32
    return %c0_i32, %c0_i32_0 : i32, i32
  }
  func.func @transform_7(%arg0: i32) -> (i32, i32) {
    %c0_i32 = arith.constant 0 : i32
    %c0_i32_0 = arith.constant 0 : i32
    return %arg0, %c0_i32 : i32, i32
  }
}

</mosaic_0001>

<bundles_post_ra>
// kernel: tpu_custom_call.1
= control target key start
LH: loop header
LB: loop body
LE: loop exit
PB: predicated region body
PF: predicated region fallthrough
CT: control target
= control target key end

     0   :  { %12 = vsyncpa [#allocation3], 0  ;;  %s685_s0 = inlined_call_operand.hbm [shape: f32[8,16], index: 0, kind: input, shape index: {}]   ;;  %s686_s1 = inlined_call_operand.hbm [shape: f32[16,128], index: 1, kind: input, shape index: {}]   ;;  %s687_s2 = inlined_call_operand.vmem [shape: f32[1,128], index: 2, kind: input, shape index: {}]   ;;  %s688_s3 = inlined_call_operand.hbm [shape: f32[128,256], index: 3, kind: input, shape index: {}]   ;;  %s689_s4 = inlined_call_operand.vmem [shape: f32[1,256], index: 4, kind: input, shape index: {}]   ;;  %s690_s5 = inlined_call_operand.hbm [shape: f32[256,128], index: 5, kind: input, shape index: {}]   ;;  %s691_s6 = inlined_call_operand.vmem [shape: f32[1,128], index: 6, kind: input, shape index: {}]   ;;  %s692_s7 = inlined_call_operand.hbm [shape: f32[8,128], index: 7, kind: output, shape index: {}]  }
   0x1   :  { %13 = vsyncpa [#allocation6], 0 }
   0x2   :  { %14 = vsyncpa [#allocation9], 0 }
   0x3   :  { %15 = vsyncpa [#allocation4], 0  ;;  %s604_s24 = smov [#allocation5]  }
   0x4   :  { %s31_s25 = sshll.u32 %s604_s24, 4  ;;  %s32_s25 = int_to_ptr.vmem [resolvable:$true] %s31_s25 }
   0x5   :  { %s504_s26 = scalar_lea.vmem %s32_s25, 256  ;;  %p509_p1 = scmp.lt.s32.totalorder %s32_s25, %s32_s25 }
   0x6   :  { %p505_p0 = scmp.ne.s32.totalorder %s32_s25, %s504_s26  ;;  %p510_p2 = scmp.lt.s32.totalorder %s504_s26, %s504_s26 }
   0x8   :  { %p511_p3 = por %p510_p2, %p509_p1 }
   0xa   :  { %p512_p4 = pnand %p511_p3, %p505_p0 }
   0xc   :  { %515 = shalt.err (!%p512_p4)
}
   0xd   :  { %s605_s27 = smov 128   ;;  %s606_s28 = smov 8  }
   0xe   :  { %37 = dma.hbm_to_vmem [thread:$0]  %s686_s1, 256, %s32_s25, [#allocation6], %s605_s27, %s605_s27, %s606_s28  }
   0xf   :  { %s607_s8 = smov [#allocation2]   ;;  %s608_s10 = smov [#allocation7]  }
  0x10   :  { %s22_s9 = sshll.u32 %s607_s8, 4  ;;  %s45_s11 = sshll.u32 %s608_s10, 4  ;;  %s23_s9 = int_to_ptr.vmem [resolvable:$true] %s22_s9  ;;  %s46_s11 = int_to_ptr.vmem [resolvable:$true] %s45_s11 }
  0x11   :  { %s524_s12 = scalar_lea.vmem %s23_s9, 128  ;;  %p529_p6 = scmp.lt.s32.totalorder %s23_s9, %s23_s9 }
  0x12   :  { %p525_p5 = scmp.ne.s32.totalorder %s23_s9, %s524_s12  ;;  %p530_p7 = scmp.lt.s32.totalorder %s524_s12, %s524_s12 }
  0x14   :  { %p531_p8 = por %p530_p7, %p529_p6 }
  0x16   :  { %p532_p9 = pnand %p531_p8, %p525_p5 }
  0x18   :  { %535 = shalt.err (!%p532_p9)
}
  0x19   :  { %25 = dma.hbm_to_vmem [thread:$0]  %s685_s0, 128, %s23_s9, [#allocation3]  }
  0x1a   :  { %s544_s15 = scalar_lea.vmem %s46_s11, 4096  ;;  %p549_p11 = scmp.lt.s32.totalorder %s46_s11, %s46_s11 }
  0x1b   :  { %p545_p10 = scmp.ne.s32.totalorder %s46_s11, %s544_s15  ;;  %p550_p12 = scmp.lt.s32.totalorder %s544_s15, %s544_s15 }
  0x1d   :  { %p551_p13 = por %p550_p12, %p549_p11 }
  0x1f   :  { %p552_p0 = pnand %p551_p13, %p545_p10 }
  0x21   :  { %555 = shalt.err (!%p552_p0)
}
  0x22   :  { %s609_s1 = smov 256   ;;  %s610_s16 = smov 16  }
  0x23   :  { %51 = dma.hbm_to_vmem [thread:$0]  %s688_s3, 4096, %s46_s11, [#allocation6], %s609_s1, %s609_s1, %s610_s16  }
  0x24   :  { %s611_s19 = smov [#allocation8]  }
  0x25   :  { %s59_s20 = sshll.u32 %s611_s19, 4  ;;  %s60_s20 = int_to_ptr.vmem [resolvable:$true] %s59_s20 }
  0x26   :  { %s564_s21 = scalar_lea.vmem %s60_s20, 4096  ;;  %p569_p2 = scmp.lt.s32.totalorder %s60_s20, %s60_s20 }
  0x27   :  { %p565_p1 = scmp.ne.s32.totalorder %s60_s20, %s564_s21  ;;  %p570_p3 = scmp.lt.s32.totalorder %s564_s21, %s564_s21 }
  0x29   :  { %p571_p4 = por %p570_p3, %p569_p2 }
  0x2b   :  { %p572_p5 = pnand %p571_p4, %p565_p1 }
  0x2d   :  { %575 = shalt.err (!%p572_p5)
}
  0x2e   :  { %65 = dma.hbm_to_vmem [thread:$0]  %s690_s5, 4096, %s60_s20, [#allocation9], %s605_s27, %s605_s27, %s606_s28  }
  0x2f   :  { %596 = dma.done.wait [#allocation3], 128  }
  0x30   :  { %597 = vsyncadd [#allocation3], 4294967168 }
  0x31   :  { %598 = dma.done.wait [#allocation6], 4352  }
  0x32   :  { %599 = vsyncadd [#allocation6], 4294962944 }
  0x33   :  { %600 = dma.done.wait [#allocation9], 4096  }
  0x34   :  { %601 = vsyncadd [#allocation9], 4294963200  ;;  %v612_v0 = vmov 0.0   ;;  %vm613_vm0 = vmmov 0   ;;  %v82_v1 = vld [vmem:[#allocation5 + $0x8] sm:$0xff]  ;;  %v81_v2 = vld [vmem:[#allocation5] sm:$0xff] }
  0x35   :  { %468 = vmatprep.subr.mxu0 %v612_v0  ;;  %472 = vmatprep.mubr.msk.f32.mxu0 %vm613_vm0, %v612_v0  ;;  %v80_v3 = vld [vmem:[#allocation2] sm:$0xff]  ;;  %vm90_vm1 = vcmask 130048   ;;  %v196_v4 = vld [vmem:[#allocation7 + $0xf8] sm:$0xff]  ;;  %v195_v5 = vld [vmem:[#allocation7 + $0xf0] sm:$0xff] }
  0x36   :  { %273 = vmatprep.mubr.f32.mxu1 %v612_v0  ;;  %469 = vmatpush3.msra.mxu0 %v82_v1  ;;  %v194_v6 = vld [vmem:[#allocation7 + $0xe8] sm:$0xff]  ;;  %v193_v7 = vld [vmem:[#allocation7 + $0xe0] sm:$0xff]  ;;  %v192_v8 = vld [vmem:[#allocation7 + $0xd8] sm:$0xff] }
  0x37   :  { %470 = vmatprep.subr.mxu0 %v612_v0  ;;  %209 = vmatprep.subr.mxu1 %v196_v4  ;;  %v191_v9 = vld [vmem:[#allocation7 + $0xd0] sm:$0xff]  ;;  %v190_v10 = vld [vmem:[#allocation7 + $0xc8] sm:$0xff]  ;;  %v189_v11 = vld [vmem:[#allocation7 + $0xc0] sm:$0xff] }
  0x38   :  { %471 = vmatpush3.msra.mxu0 %v81_v2  ;;  %210 = vmatpush1.msra.mxu1 %v195_v5  ;;  %v188_v12 = vld [vmem:[#allocation7 + $0xb8] sm:$0xff]  ;;  %v187_v13 = vld [vmem:[#allocation7 + $0xb0] sm:$0xff]  ;;  %v186_v14 = vld [vmem:[#allocation7 + $0xa8] sm:$0xff] }
  0x39   :  { %473 = vmatmul.mubr.msk.f32.vlgmr.msra.gmra.mxu0 %vm90_vm1, %v80_v3  ;;  %211 = vmatprep.subr.mxu1 %v194_v6  ;;  %v185_v15 = vld [vmem:[#allocation7 + $0xa0] sm:$0xff]  ;;  %v184_v16 = vld [vmem:[#allocation7 + $0x98] sm:$0xff]  ;;  %v183_v17 = vld [vmem:[#allocation7 + $0x90] sm:$0xff] }
  0x3a   :  { %212 = vmatpush1.msra.mxu1 %v193_v7  ;;  %v182_v18 = vld [vmem:[#allocation7 + $0x88] sm:$0xff]  ;;  %v181_v19 = vld [vmem:[#allocation7 + $0x80] sm:$0xff]  ;;  %v180_v20 = vld [vmem:[#allocation7 + $0x78] sm:$0xff] }
  0x3b   :  { %213 = vmatprep.subr.mxu1 %v192_v8  ;;  %v179_v21 = vld [vmem:[#allocation7 + $0x70] sm:$0xff]  ;;  %v178_v22 = vld [vmem:[#allocation7 + $0x68] sm:$0xff]  ;;  %v177_v23 = vld [vmem:[#allocation7 + $0x60] sm:$0xff] }
  0x3c   :  { %214 = vmatpush1.msra.mxu1 %v191_v9  ;;  %v176_v24 = vld [vmem:[#allocation7 + $0x58] sm:$0xff]  ;;  %v175_v25 = vld [vmem:[#allocation7 + $0x50] sm:$0xff]  ;;  %v174_v26 = vld [vmem:[#allocation7 + $0x48] sm:$0xff]  ;;  %v199_v9 = vlaneseq }
  0x3d   :  { %215 = vmatprep.subr.mxu1 %v190_v10  ;;  %v173_v27 = vld [vmem:[#allocation7 + $0x40] sm:$0xff]  ;;  %v172_v28 = vld [vmem:[#allocation7 + $0x38] sm:$0xff]  ;;  %v171_v29 = vld [vmem:[#allocation7 + $0x30] sm:$0xff] }
  0x3e   :  { %216 = vmatpush1.msra.mxu1 %v189_v11  ;;  %v170_v30 = vld [vmem:[#allocation7 + $0x28] sm:$0xff]  ;;  %v169_v31 = vld [vmem:[#allocation7 + $0x20] sm:$0xff]  ;;  %v168_v32 = vld [vmem:[#allocation7 + $0x18] sm:$0xff]  ;;  %v200_v10 = vshrl.u32 %v199_v9, 7 }
  0x3f   :  { %217 = vmatprep.subr.mxu1 %v188_v12  ;;  %v167_v33 = vld [vmem:[#allocation7 + $0x10] sm:$0xff]  ;;  %v166_v34 = vld [vmem:[#allocation7 + $0x8] sm:$0xff]  ;;  %v165_v35 = vld [vmem:[#allocation7] sm:$0xff] }
  0x40   :  { %218 = vmatpush1.msra.mxu1 %v187_v13  ;;  %v313_v36 = vld [vmem:[#allocation8 + $0xf8] sm:$0xff]  ;;  %v312_v38 = vld [vmem:[#allocation8 + $0xf0] sm:$0xff]  ;;  %v311_v40 = vld [vmem:[#allocation8 + $0xe8] sm:$0xff]  ;;  %v201_v11 = vsub.s32 0, %v200_v10  ;;  %v205_v13 = vsub.s32 1, %v200_v10 }
  0x41   :  { %219 = vmatprep.subr.mxu1 %v186_v14  ;;  %v297_v37 = vld [vmem:[#allocation8 + $0x78] sm:$0xff]  ;;  %433 = vmatprep.subr.mxu0 %v313_v36  ;;  %v296_v39 = vld [vmem:[#allocation8 + $0x70] sm:$0xff]  ;;  %v295_v41 = vld [vmem:[#allocation8 + $0x68] sm:$0xff] }
  0x42   :  { %220 = vmatpush1.msra.mxu1 %v185_v15  ;;  %434 = vmatpush3.msra.mxu0 %v297_v37  ;;  %v310_v42 = vld [vmem:[#allocation8 + $0xe0] sm:$0xff]  ;;  %v309_v44 = vld [vmem:[#allocation8 + $0xd8] sm:$0xff]  ;;  %v308_v46 = vld [vmem:[#allocation8 + $0xd0] sm:$0xff] }
  0x43   :  { %221 = vmatprep.subr.mxu1 %v184_v16  ;;  %435 = vmatprep.subr.mxu0 %v312_v38  ;;  %v294_v43 = vld [vmem:[#allocation8 + $0x60] sm:$0xff]  ;;  %v293_v45 = vld [vmem:[#allocation8 + $0x58] sm:$0xff]  ;;  %v292_v47 = vld [vmem:[#allocation8 + $0x50] sm:$0xff] }
  0x44   :  { %222 = vmatpush1.msra.mxu1 %v183_v17  ;;  %436 = vmatpush3.msra.mxu0 %v296_v39  ;;  %v427_v48 = vld [vmem:[%s687_s2] ss:$0 sm:$0xff]  ;;  %v306_v55 = vld [vmem:[#allocation8 + $0xc0] sm:$0xff]  ;;  %v305_v57 = vld [vmem:[#allocation8 + $0xb8] sm:$0xff] }
  0x45   :  { %223 = vmatprep.subr.mxu1 %v182_v18  ;;  %437 = vmatprep.subr.mxu0 %v311_v40  ;;  %v307_v53 = vld [vmem:[#allocation8 + $0xc8] sm:$0xff]  ;;  %v290_v56 = vld [vmem:[#allocation8 + $0x40] sm:$0xff]  ;;  %v289_v58 = vld [vmem:[#allocation8 + $0x38] sm:$0xff] }
  0x46   :  { %224 = vmatpush1.msra.mxu1 %v181_v19  ;;  %438 = vmatpush3.msra.mxu0 %v295_v41  ;;  %v291_v54 = vld [vmem:[#allocation8 + $0x48] sm:$0xff]  ;;  %v304_v59 = vld [vmem:[#allocation8 + $0xb0] sm:$0xff]  ;;  %v302_v63 = vld [vmem:[#allocation8 + $0xa0] sm:$0xff] }
  0x47   :  { %225 = vmatprep.subr.mxu1 %v180_v20  ;;  %439 = vmatprep.subr.mxu0 %v310_v42  ;;  %v288_v60 = vld [vmem:[#allocation8 + $0x30] sm:$0xff]  ;;  %v303_v61 = vld [vmem:[#allocation8 + $0xa8] sm:$0xff]  ;;  %v286_v0 = vld [vmem:[#allocation8 + $0x20] sm:$0xff] }
  0x48   :  { %226 = vmatpush1.msra.mxu1 %v179_v21  ;;  %440 = vmatpush3.msra.mxu0 %v294_v43  ;;  %v287_v62 = vld [vmem:[#allocation8 + $0x28] sm:$0xff]  ;;  %v301_v1 = vld [vmem:[#allocation8 + $0x98] sm:$0xff]  ;;  %v300_v3 = vld [vmem:[#allocation8 + $0x90] sm:$0xff] }
  0x49   :  { %227 = vmatprep.subr.mxu1 %v178_v22  ;;  %441 = vmatprep.subr.mxu0 %v309_v44  ;;  %v285_v2 = vld [vmem:[#allocation8 + $0x18] sm:$0xff]  ;;  %v284_v4 = vld [vmem:[#allocation8 + $0x10] sm:$0xff]  ;;  %v299_v5 = vld [vmem:[#allocation8 + $0x88] sm:$0xff] }
  0x4a   :  { %228 = vmatpush1.msra.mxu1 %v177_v23  ;;  %442 = vmatpush3.msra.mxu0 %v293_v45  ;;  %v283_v6 = vld [vmem:[#allocation8 + $0x8] sm:$0xff]  ;;  %v298_v7 = vld [vmem:[#allocation8 + $0x80] sm:$0xff]  ;;  %v392_v23 = vand.u32 127, %v199_v9 }
  0x4b   :  { %229 = vmatprep.subr.mxu1 %v176_v24  ;;  %443 = vmatprep.subr.mxu0 %v308_v46  ;;  %v282_v8 = vld [vmem:[#allocation8] sm:$0xff]  ;;  %v197_v12 = vld [vmem:[%s689_s4] sm:$0x3]  ;;  %s614_s4 = smov [#allocation10]  }
  0x4c   :  { %230 = vmatpush1.msra.mxu1 %v175_v25  ;;  %444 = vmatpush3.msra.mxu0 %v292_v47  ;;  %v202_v14 = vrot.slane %v197_v12, %v201_v11  ;;  %v206_v15 = vrot.slane %v197_v12, %v205_v13  ;;  %v429_v25 = vld [vmem:[%s691_s6] ss:$0 sm:$0xff]  ;;  %vm393_vm2 = vcmp.lt.s32.totalorder %v392_v23, 6  ;;  %s416_s26 = sshll.u32 %s614_s4, 4  ;;  %vm407_vm3 = vcmp.eq.s32.totalorder %v392_v23, 6  ;;  %s417_s26 = int_to_ptr.vmem [resolvable:$true] %s416_s26 }
  0x4d   :  { %231 = vmatprep.subr.mxu1 %v174_v26  ;;  %445 = vmatprep.subr.mxu0 %v307_v53  ;;  %s576_s6 = scalar_lea.vmem %s417_s26, 128  ;;  %p581_p7 = scmp.lt.s32.totalorder %s417_s26, %s417_s26 }
  0x4e   :  { %232 = vmatpush1.msra.mxu1 %v173_v27  ;;  %446 = vmatpush3.msra.mxu0 %v291_v54  ;;  %p577_p6 = scmp.ne.s32.totalorder %s417_s26, %s576_s6  ;;  %p582_p8 = scmp.lt.s32.totalorder %s576_s6, %s576_s6 }
  0x4f   :  { %233 = vmatprep.subr.mxu1 %v172_v28  ;;  %447 = vmatprep.subr.mxu0 %v306_v55 }
  0x50   :  { %234 = vmatpush1.msra.mxu1 %v171_v29  ;;  %448 = vmatpush3.msra.mxu0 %v290_v56  ;;  %p583_p9 = por %p582_p8, %p581_p7 }
  0x51   :  { %235 = vmatprep.subr.mxu1 %v170_v30  ;;  %449 = vmatprep.subr.mxu0 %v305_v57 }
  0x52   :  { %236 = vmatpush1.msra.mxu1 %v169_v31  ;;  %450 = vmatpush3.msra.mxu0 %v289_v58  ;;  %p584_p10 = pnand %p583_p9, %p577_p6 }
  0x53   :  { %237 = vmatprep.subr.mxu1 %v168_v32  ;;  %451 = vmatprep.subr.mxu0 %v304_v59 }
  0x54   :  { %238 = vmatpush1.msra.mxu1 %v167_v33  ;;  %452 = vmatpush3.msra.mxu0 %v288_v60 }
  0x55   :  { %239 = vmatprep.subr.mxu1 %v166_v34  ;;  %453 = vmatprep.subr.mxu0 %v303_v61 }
  0x56   :  { %240 = vmatpush1.msra.mxu1 %v165_v35  ;;  %454 = vmatpush3.msra.mxu0 %v287_v62 }
  0x57   :  { %455 = vmatprep.subr.mxu0 %v302_v63 }
  0x58   :  { %456 = vmatpush3.msra.mxu0 %v286_v0 }
  0x59   :  { %457 = vmatprep.subr.mxu0 %v301_v1 }
  0x5a   :  { %458 = vmatpush3.msra.mxu0 %v285_v2 }
  0x5b   :  { %459 = vmatprep.subr.mxu0 %v300_v3 }
  0x5c   :  { %460 = vmatpush3.msra.mxu0 %v284_v4 }
  0x5d   :  { %461 = vmatprep.subr.mxu0 %v299_v5 }
  0x5e   :  { %462 = vmatpush3.msra.mxu0 %v283_v6 }
  0x5f   :  { %463 = vmatprep.subr.mxu0 %v298_v7 }
  0x60   :  { %464 = vmatpush3.msra.mxu0 %v282_v8 }
  0xf9   :  { %v160_v49 = vpop.f32.mrf.mxu0 }
  0xfa   :  { %v161_v50 = vadd.f32 %v427_v48, %v160_v49 }
  0xfb   :  { %v474_v51 = vpop.f32.mrf.mxu0 }
  0xfc   :  { %486 = vtanh.f32 %v161_v50 }
 0x109   :  { %v487_v52 = vpop.eup %486 }
 0x10a   :  { %274 = vmatmul.mubr.f32.vlgmr.msra.gmra.mxu1 %v487_v52 }
 0x1ca   :  { %v275_v16 = vpop.f32.mrf.mxu1 }
 0x1cb   :  { %v276_v17 = vadd.f32 %v275_v16, %v202_v14 }
 0x1cc   :  { %v277_v18 = vpop.f32.mrf.mxu1 }
 0x1cd   :  { %v278_v19 = vadd.f32 %v277_v18, %v206_v15 }
 0x1cf   :  { %488 = vtanh.f32 %v278_v19 }
 0x1d0   :  { %490 = vtanh.f32 %v276_v17 }
 0x1dc   :  { %v489_v20 = vpop.eup %488 }
 0x1dd   :  { %v491_v21 = vpop.eup %490  ;;  %385 = vmatprep.mubr.f32.mxu0 %v489_v20 }
 0x1de   :  { %386 = vmatmul.mubr.f32.vlgmr.msra.gmra.mxu0 %v491_v21 }
 0x29e   :  { %v465_v22 = vpop.f32.mrf.mxu0 }
 0x2a0   :  { %v466_v24 = vpop.f32.mrf.mxu0 }
 0x2a1   :  { %v467_v26 = vadd.f32 %v466_v24, %v465_v22 }
 0x2a3   :  { %v388_v27 = vadd.f32 %v467_v26, %v429_v25 }
 0x2a5   :  { %v394_v28 = vsel %vm393_vm2, %v388_v27, -1e+30 }
 0x2a6   :  { %395 = vmax.xlane.f32.xlu0 %v394_v28 }
 0x32f   :  { %v396_v29 = vpop.xlane.xlu0 %395 }
 0x330   :  { %v397_v30 = vsub.f32 %v394_v28, %v396_v29 }
 0x332   :  { %v398_v31 = vmul.f32 1.442695, %v397_v30 }
 0x334   :  { %492 = vpow2.f32 %v398_v31 }
 0x341   :  { %v493_v32 = vpop.eup %492 }
 0x342   :  { %400 = vadd.xlane.f32.xlu0 %v493_v32 }
 0x3cb   :  { %v401_v33 = vpop.xlane.xlu0 %400 }
 0x3cc   :  { %494 = vrcp.f32 %v401_v33 }
 0x3d9   :  { %v495_v34 = vpop.eup %494 }
 0x3da   :  { %v403_v35 = vmul.f32 %v495_v34, %v401_v33 }
 0x3dc   :  { %v404_v36 = vsub.f32 2.0, %v403_v35 }
 0x3de   :  { %v405_v37 = vmul.f32 %v495_v34, %v404_v36 }
 0x3e0   :  { %v406_v38 = vmul.f32 %v493_v32, %v405_v37 }
 0x3e2   :  { %v408_v39 = vsel %vm407_vm3, %v388_v27, %v406_v38 }
 0x3e3   :  { %409 = vst [vmem:[#allocation10] sm:$0xff] %v408_v39 }
 0x3e4   :  { %587 = shalt.err (!%p584_p10)
}
 0x3e5   :  { %419 = dma.vmem_to_hbm [thread:$0]  %s417_s26, 128, %s692_s7, [#allocation4]  }
 0x3e6   :  { %602 = dma.done.wait [#allocation4], 128  }
 0x3e7   :  { %603 = vsyncadd [#allocation4], 4294967168 }
 0x3e8   :  { %423 = vsyncpa [#allocation3], 1 }
 0x3e9   :  { %424 = vsyncpa [#allocation6], 1 }
 0x3ea   :  { %425 = vsyncpa [#allocation9], 1 }
 0x3eb   :  { %426 = vsyncpa [#allocation4], 1 }

</bundles_post_ra>
